<compile_context>
chip_gen: v6e
topology: v6e:2x2x1
jax: 0.10.0
libtpu: 0.0.40
codegen_flags: <defaults>
</compile_context>

<pallas_src>
import functools

import jax
import jax.numpy as jnp
from jax.experimental import pallas as pl
from jax.experimental.pallas import tpu as pltpu

INPUT_SIZE = 784
HIDDEN_SIZE = 120
NUM_CLASSES = 10

HIDDEN_PAD = 128   # 120 -> 128 (lane multiple; do NOT widen to 256 — mem-bound kernel)
CLASSES_PAD = 128  # 10  -> 128 (lane-dense output store)


def mlp_kernel(x_ref, w1_ref, b1_ref, w2_ref, b2_ref, o_ref):
    # Cast activations to bf16 in-kernel (avoids an extra HBM pass over x).
    x_bf = x_ref[...].astype(jnp.bfloat16)
    # Layer 1: [TB, 784] bf16 @ [784, 128] bf16 -> f32 accumulation on the MXU.
    h = jnp.dot(x_bf, w1_ref[...], preferred_element_type=jnp.float32)
    # Bias add + ReLU in f32 on the VPU.
    h = jnp.maximum(h + b1_ref[...], 0.0)
    # Layer 2: bf16 operands, f32 accumulation.
    out = jnp.dot(h.astype(jnp.bfloat16), w2_ref[...],
                  preferred_element_type=jnp.float32)
    # bf16 store halves output writeback; lane dim stays 128-wide (unmasked vst).
    o_ref[...] = (out + b2_ref[...]).astype(o_ref.dtype)


def prepare_params(w1, b1, w2, b2):
    """One-time weight padding / bf16 cast, hoisted out of the per-call path.

    w1: [784, 120]  (stored [in, out], i.e. transposed vs torch nn.Linear)
    b1: [120] or [1, 120]
    w2: [120, 10]
    b2: [10] or [1, 10]
    """
    w1_p = jnp.zeros((INPUT_SIZE, HIDDEN_PAD), jnp.bfloat16).at[:, :HIDDEN_SIZE].set(
        w1.astype(jnp.bfloat16))
    b1_p = jnp.zeros((1, HIDDEN_PAD), jnp.float32).at[:, :HIDDEN_SIZE].set(
        jnp.reshape(b1, (1, HIDDEN_SIZE)).astype(jnp.float32))
    w2_p = jnp.zeros((HIDDEN_PAD, CLASSES_PAD), jnp.bfloat16).at[
        :HIDDEN_SIZE, :NUM_CLASSES].set(w2.astype(jnp.bfloat16))
    b2_p = jnp.zeros((1, CLASSES_PAD), jnp.float32).at[:, :NUM_CLASSES].set(
        jnp.reshape(b2, (1, NUM_CLASSES)).astype(jnp.float32))
    return w1_p, b1_p, w2_p, b2_p


@functools.partial(jax.jit, static_argnames=("tb",))
def mlp_forward(x, w1_p, b1_p, w2_p, b2_p, *, tb=1024):
    """x: [B, 784] (f32 or bf16). Padded params come from prepare_params()."""
    B = x.shape[0]

    if B <= tb:
        # Single block covering the whole (small) batch: block dims == array dims,
        # so the (8,128) constraint is satisfied and no padding copy of x is made.
        tb_eff, n_tiles, B_pad = B, 1, B
    else:
        # Large batch: big tiles amortize the ~0.35us/step pipeline overhead and
        # the 1-D "parallel" grid shards tiles across v7x's two TensorCores.
        tb_eff = tb
        n_tiles = pl.cdiv(B, tb_eff)
        B_pad = n_tiles * tb_eff
        if B_pad != B:
            # Fallback only for ragged large batches (extra pass over x);
            # choose tb dividing B to avoid it.
            x = jnp.pad(x, ((0, B_pad - B), (0, 0)))

    out_padded = pl.pallas_call(
        mlp_kernel,
        out_shape=jax.ShapeDtypeStruct((B_pad, CLASSES_PAD), jnp.bfloat16),
        grid_spec=pltpu.PrefetchScalarGridSpec(
            num_scalar_prefetch=0,
            grid=(n_tiles,),
            in_specs=[
                # x: tiled over batch, double-buffered by the auto-pipeline.
                pl.BlockSpec((tb_eff, INPUT_SIZE), lambda i: (i, 0)),
                # Weights / biases: constant index maps -> DMA'd once, VMEM-resident.
                pl.BlockSpec((INPUT_SIZE, HIDDEN_PAD), lambda i: (0, 0)),
                pl.BlockSpec((1, HIDDEN_PAD), lambda i: (0, 0)),
                pl.BlockSpec((HIDDEN_PAD, CLASSES_PAD), lambda i: (0, 0)),
                pl.BlockSpec((1, CLASSES_PAD), lambda i: (0, 0)),
            ],
            out_specs=pl.BlockSpec((tb_eff, CLASSES_PAD), lambda i: (i, 0)),
        ),
        compiler_params=pltpu.CompilerParams(
            dimension_semantics=("parallel",),  # batch tiles across TCs (v7x)
        ),
    )(x, w1_p, b1_p, w2_p, b2_p)

    # Drop batch / lane padding; return f32 logits (matches torch output dtype).
    return out_padded[:B, :NUM_CLASSES].astype(jnp.float32)


def init_params(key):
    """Deterministic init mirroring nn.Linear default U(-1/sqrt(fan_in), +),
    with weights stored as [in, out]."""
    k1, k2, k3, k4 = jax.random.split(key, 4)
    bound1 = 1.0 / jnp.sqrt(INPUT_SIZE)
    w1 = jax.random.uniform(k1, (INPUT_SIZE, HIDDEN_SIZE), jnp.float32,
                            minval=-bound1, maxval=bound1)
    b1 = jax.random.uniform(k2, (1, HIDDEN_SIZE), jnp.float32,
                            minval=-bound1, maxval=bound1)
    bound2 = 1.0 / jnp.sqrt(HIDDEN_SIZE)
    w2 = jax.random.uniform(k3, (HIDDEN_SIZE, NUM_CLASSES), jnp.float32,
                            minval=-bound2, maxval=bound2)
    b2 = jax.random.uniform(k4, (1, NUM_CLASSES), jnp.float32,
                            minval=-bound2, maxval=bound2)
    return w1, b1, w2, b2


if __name__ == "__main__":
    key = jax.random.PRNGKey(0)
    kx, kp = jax.random.split(key)
    B = 8  # small demo batch -> single full-array block, no padding copies
    x = jax.random.normal(kx, (B, INPUT_SIZE), jnp.float32)
    w1, b1, w2, b2 = init_params(kp)
    params = prepare_params(w1, b1, w2, b2)  # one-time padded bf16 weights

    out = mlp_forward(x, *params)
    out = jax.block_until_ready(out)

    # Pure-JAX reference at matching precision: bf16 operands, f32 accumulate,
    # bf16 hidden activations, bf16 output store.
    xb = x.astype(jnp.bfloat16).astype(jnp.float32)
    w1b = w1.astype(jnp.bfloat16).astype(jnp.float32)
    w2b = w2.astype(jnp.bfloat16).astype(jnp.float32)
    h = jnp.maximum(xb @ w1b + b1, 0.0)
    h = h.astype(jnp.bfloat16).astype(jnp.float32)
    ref = (h @ w2b + b2).astype(jnp.bfloat16).astype(jnp.float32)

    assert out.shape == (B, NUM_CLASSES)
    assert jnp.allclose(out, ref, atol=1e-2, rtol=1e-2), (
        float(jnp.max(jnp.abs(out - ref))))

    print("KERNEL_OK")
</pallas_src>

<mosaic_0001>
module attributes {stable_mosaic.version = 11 : i64} {
  func.func @mlp_kernel(%arg0: i32, %arg1: memref<8x784xf32, #tpu.memory_space<vmem>>, %arg2: memref<784x128xbf16, #tpu.memory_space<vmem>>, %arg3: memref<1x128xf32, #tpu.memory_space<vmem>>, %arg4: memref<128x128xbf16, #tpu.memory_space<vmem>>, %arg5: memref<1x128xf32, #tpu.memory_space<vmem>>, %arg6: memref<8x128xbf16, #tpu.memory_space<vmem>>) attributes {dimension_semantics = [#tpu.dimension_semantics<parallel>], iteration_bounds = array<i64: 1>, scalar_prefetch = 0 : i64, scratch_operands = 0 : i64, tpu.core_type = #tpu.core_type<tc>, window_params = [{transform_indices = @transform_0, window_bounds = array<i64: 8, 784>}, {pipeline_mode = #tpu.pipeline_mode<synchronous>, transform_indices = @transform_1, window_bounds = array<i64: 784, 128>}, {pipeline_mode = #tpu.pipeline_mode<synchronous>, transform_indices = @transform_2, window_bounds = array<i64: 1, 128>}, {pipeline_mode = #tpu.pipeline_mode<synchronous>, transform_indices = @transform_3, window_bounds = array<i64: 128, 128>}, {pipeline_mode = #tpu.pipeline_mode<synchronous>, transform_indices = @transform_4, window_bounds = array<i64: 1, 128>}, {transform_indices = @transform_5, window_bounds = array<i64: 8, 128>}]} {
    %c0 = arith.constant 0 : index
    %c0_0 = arith.constant 0 : index
    %0 = vector.load %arg1[%c0, %c0_0] : memref<8x784xf32, #tpu.memory_space<vmem>>, vector<8x784xf32>
    %1 = arith.truncf %0 : vector<8x784xf32> to vector<8x784xbf16>
    %c0_1 = arith.constant 0 : index
    %c0_2 = arith.constant 0 : index
    %2 = vector.load %arg2[%c0_1, %c0_2] : memref<784x128xbf16, #tpu.memory_space<vmem>>, vector<784x128xbf16>
    %cst = arith.constant dense<0.000000e+00> : vector<8x128xf32>
    %3 = tpu.matmul %1, %2, %cst {dimension_numbers = #tpu.dot_dimension_numbers<[1], [0], [0], [1], [0, 0, 1, 1], [], []>} : vector<8x784xbf16>, vector<784x128xbf16>, vector<8x128xf32> -> vector<8x128xf32>
    %c0_3 = arith.constant 0 : index
    %c0_4 = arith.constant 0 : index
    %4 = vector.load %arg3[%c0_3, %c0_4] : memref<1x128xf32, #tpu.memory_space<vmem>>, vector<1x128xf32>
    %5 = vector.broadcast %4 : vector<1x128xf32> to vector<8x128xf32>
    %6 = arith.addf %3, %5 : vector<8x128xf32>
    %cst_5 = arith.constant 0.000000e+00 : f32
    %7 = vector.broadcast %cst_5 : f32 to vector<8x128xf32>
    %8 = arith.maximumf %6, %7 : vector<8x128xf32>
    %9 = arith.truncf %8 : vector<8x128xf32> to vector<8x128xbf16>
    %c0_6 = arith.constant 0 : index
    %c0_7 = arith.constant 0 : index
    %10 = vector.load %arg4[%c0_6, %c0_7] : memref<128x128xbf16, #tpu.memory_space<vmem>>, vector<128x128xbf16>
    %cst_8 = arith.constant dense<0.000000e+00> : vector<8x128xf32>
    %11 = tpu.matmul %9, %10, %cst_8 {dimension_numbers = #tpu.dot_dimension_numbers<[1], [0], [0], [1], [0, 0, 1, 1], [], []>} : vector<8x128xbf16>, vector<128x128xbf16>, vector<8x128xf32> -> vector<8x128xf32>
    %c0_9 = arith.constant 0 : index
    %c0_10 = arith.constant 0 : index
    %12 = vector.load %arg5[%c0_9, %c0_10] : memref<1x128xf32, #tpu.memory_space<vmem>>, vector<1x128xf32>
    %13 = vector.broadcast %12 : vector<1x128xf32> to vector<8x128xf32>
    %14 = arith.addf %11, %13 : vector<8x128xf32>
    %15 = arith.truncf %14 : vector<8x128xf32> to vector<8x128xbf16>
    %c0_11 = arith.constant 0 : index
    %c0_12 = arith.constant 0 : index
    %16 = vector.load %arg6[%c0_11, %c0_12] : memref<8x128xbf16, #tpu.memory_space<vmem>>, vector<8x128xbf16>
    tpu.vector_store %arg6[%c0_11, %c0_12], %15 {strides = array<i32>} : memref<8x128xbf16, #tpu.memory_space<vmem>>, vector<8x128xbf16>,
    return
  }
  func.func @transform_0(%arg0: i32) -> (i32, i32) {
    %c0_i32 = arith.constant 0 : i32
    %c0_i32_0 = arith.constant 0 : i32
    return %arg0, %c0_i32 : i32, i32
  }
  func.func @transform_1(%arg0: i32) -> (i32, i32) {
    %c0_i32 = arith.constant 0 : i32
    %c0_i32_0 = arith.constant 0 : i32
    %c0_i32_1 = arith.constant 0 : i32
    return %c0_i32, %c0_i32_0 : i32, i32
  }
  func.func @transform_2(%arg0: i32) -> (i32, i32) {
    %c0_i32 = arith.constant 0 : i32
    %c0_i32_0 = arith.constant 0 : i32
    %c0_i32_1 = arith.constant 0 : i32
    return %c0_i32, %c0_i32_0 : i32, i32
  }
  func.func @transform_3(%arg0: i32) -> (i32, i32) {
    %c0_i32 = arith.constant 0 : i32
    %c0_i32_0 = arith.constant 0 : i32
    %c0_i32_1 = arith.constant 0 : i32
    return %c0_i32, %c0_i32_0 : i32, i32
  }
  func.func @transform_4(%arg0: i32) -> (i32, i32) {
    %c0_i32 = arith.constant 0 : i32
    %c0_i32_0 = arith.constant 0 : i32
    %c0_i32_1 = arith.constant 0 : i32
    return %c0_i32, %c0_i32_0 : i32, i32
  }
  func.func @transform_5(%arg0: i32) -> (i32, i32) {
    %c0_i32 = arith.constant 0 : i32
    %c0_i32_0 = arith.constant 0 : i32
    return %arg0, %c0_i32 : i32, i32
  }
}

</mosaic_0001>

<bundles_post_ra>
// kernel: mlp_forward.1
= control target key start
LH: loop header
LB: loop body
LE: loop exit
PB: predicated region body
PF: predicated region fallthrough
CT: control target
= control target key end

     0   :  { %10 = vsyncpa [#allocation3], 0  ;;  %s1117_s0 = inlined_call_operand.hbm [shape: f32[8,784], index: 0, kind: input, shape index: {}]   ;;  %s1118_s1 = inlined_call_operand.hbm [shape: bf16[784,128], index: 1, kind: input, shape index: {}]   ;;  %s1119_s2 = inlined_call_operand.vmem [shape: f32[1,128], index: 2, kind: input, shape index: {}]   ;;  %s1120_s3 = inlined_call_operand.hbm [shape: bf16[128,128], index: 3, kind: input, shape index: {}]   ;;  %s1121_s4 = inlined_call_operand.vmem [shape: f32[1,128], index: 4, kind: input, shape index: {}]   ;;  %s1122_s5 = inlined_call_operand.vmem [shape: bf16[8,128], index: 5, kind: output, shape index: {}]  }
   0x1   :  { %11 = vsyncpa [#allocation5], 0  ;;  %s1049_s18 = smov [#allocation4]  }
   0x2   :  { %s27_s19 = sshll.u32 %s1049_s18, 4  ;;  %s28_s19 = int_to_ptr.vmem [resolvable:$true] %s27_s19 }
   0x3   :  { %s993_s20 = scalar_lea.vmem %s28_s19, 6272  ;;  %p998_p1 = scmp.lt.s32.totalorder %s28_s19, %s28_s19 }
   0x4   :  { %p994_p0 = scmp.ne.s32.totalorder %s28_s19, %s993_s20  ;;  %p999_p2 = scmp.lt.s32.totalorder %s993_s20, %s993_s20 }
   0x6   :  { %p1000_p3 = por %p999_p2, %p998_p1 }
   0x8   :  { %p1001_p4 = pnand %p1000_p3, %p994_p0 }
   0xa   :  { %1004 = shalt.err (!%p1001_p4)
}
   0xb   :  { %s1050_s21 = smov 64   ;;  %s1051_s22 = smov 4  }
   0xc   :  { %33 = dma.hbm_to_vmem [thread:$0]  %s1118_s1, 6272, %s28_s19, [#allocation5], %s1050_s21, %s1050_s21, %s1051_s22  }
   0xd   :  { %s1052_s25 = smov [#allocation2]   ;;  %s1053_s27 = smov [#allocation6]  }
   0xe   :  { %s18_s26 = sshll.u32 %s1052_s25, 4  ;;  %s41_s28 = sshll.u32 %s1053_s27, 4  ;;  %s19_s26 = int_to_ptr.vmem [resolvable:$true] %s18_s26  ;;  %s42_s28 = int_to_ptr.vmem [resolvable:$true] %s41_s28 }
   0xf   :  { %s1013_s29 = scalar_lea.vmem %s19_s26, 896  ;;  %p1018_p6 = scmp.lt.s32.totalorder %s19_s26, %s19_s26 }
  0x10   :  { %p1014_p5 = scmp.ne.s32.totalorder %s19_s26, %s1013_s29  ;;  %p1019_p7 = scmp.lt.s32.totalorder %s1013_s29, %s1013_s29 }
  0x12   :  { %p1020_p8 = por %p1019_p7, %p1018_p6 }
  0x14   :  { %p1021_p9 = pnand %p1020_p8, %p1014_p5 }
  0x16   :  { %1024 = shalt.err (!%p1021_p9)
}
  0x17   :  { %21 = dma.hbm_to_vmem [thread:$0]  %s1117_s0, 896, %s19_s26, [#allocation3]  }
  0x18   :  { %s1033_s7 = scalar_lea.vmem %s42_s28, 1024  ;;  %p1038_p11 = scmp.lt.s32.totalorder %s42_s28, %s42_s28 }
  0x19   :  { %p1034_p10 = scmp.ne.s32.totalorder %s42_s28, %s1033_s7  ;;  %p1039_p12 = scmp.lt.s32.totalorder %s1033_s7, %s1033_s7 }
  0x1b   :  { %p1040_p13 = por %p1039_p12, %p1038_p11 }
  0x1d   :  { %p1041_p0 = pnand %p1040_p13, %p1034_p10 }
  0x1f   :  { %1044 = shalt.err (!%p1041_p0)
}
  0x20   :  { %47 = dma.hbm_to_vmem [thread:$0]  %s1120_s3, 1024, %s42_s28, [#allocation5], %s1050_s21, %s1050_s21, %s1051_s22  }
  0x21   :  { %1045 = dma.done.wait [#allocation3], 896  }
  0x22   :  { %1046 = vsyncadd [#allocation3], 4294966400 }
  0x23   :  { %1047 = dma.done.wait [#allocation5], 7296  }
  0x24   :  { %1048 = vsyncadd [#allocation5], 4294960000  ;;  %v928_v0 = vld [vmem:[#allocation4 + $0x78] sm:$0xff]   ;;  %v932_v4 = vld [vmem:[#allocation4 + $0x70] sm:$0xff]   ;;  %v1054_v44 = vmov 0.0   ;;  %vm1055_vm0 = vmmov 0  }
  0x25   :  { %v929_v1 = vld [vmem:[#allocation4 + $0x38] sm:$0xff]   ;;  %818 = vmatprep.subr.bf16.mxu0 %v928_v0  ;;  %v933_v5 = vld [vmem:[#allocation4 + $0x30] sm:$0xff]   ;;  %v936_v8 = vld [vmem:[#allocation4 + $0x68] sm:$0xff]   ;;  %vm473_vm1 = vcmask 130048  }
  0x26   :  { %v930_v2 = vld [vmem:[#allocation4 + $0xf8] sm:$0xff]   ;;  %819 = vmatpush3.bf16.msra.mxu0 %v929_v1  ;;  %v934_v6 = vld [vmem:[#allocation4 + $0xf0] sm:$0xff]   ;;  %v937_v9 = vld [vmem:[#allocation4 + $0x28] sm:$0xff]  }
  0x27   :  { %v931_v3 = vld [vmem:[#allocation4 + $0xb8] sm:$0xff]   ;;  %840 = vmatprep.subr.bf16.mxu1 %v930_v2  ;;  %820 = vmatprep.subr.bf16.mxu0 %v932_v4  ;;  %v935_v7 = vld [vmem:[#allocation4 + $0xb0] sm:$0xff]   ;;  %v938_v10 = vld [vmem:[#allocation4 + $0xe8] sm:$0xff]  }
  0x28   :  { %841 = vmatpush3.bf16.msra.mxu1 %v931_v3  ;;  %v939_v11 = vld [vmem:[#allocation4 + $0xa8] sm:$0xff]   ;;  %v940_v12 = vld [vmem:[#allocation4 + $0x60] sm:$0xff]   ;;  %v944_v16 = vld [vmem:[#allocation4 + $0x58] sm:$0xff]  }
  0x29   :  { %842 = vmatprep.subr.bf16.mxu1 %v934_v6  ;;  %v941_v13 = vld [vmem:[#allocation4 + $0x20] sm:$0xff]   ;;  %v945_v17 = vld [vmem:[#allocation4 + $0x18] sm:$0xff]   ;;  %v948_v20 = vld [vmem:[#allocation4 + $0x50] sm:$0xff]  }
  0x2a   :  { %821 = vmatpush3.bf16.msra.mxu0 %v933_v5  ;;  %v942_v14 = vld [vmem:[#allocation4 + $0xe0] sm:$0xff]   ;;  %v946_v18 = vld [vmem:[#allocation4 + $0xd8] sm:$0xff]   ;;  %v949_v21 = vld [vmem:[#allocation4 + $0x10] sm:$0xff]  }
  0x2b   :  { %822 = vmatprep.subr.bf16.mxu0 %v936_v8  ;;  %v943_v15 = vld [vmem:[#allocation4 + $0xa0] sm:$0xff]   ;;  %v947_v19 = vld [vmem:[#allocation4 + $0x98] sm:$0xff]   ;;  %v950_v22 = vld [vmem:[#allocation4 + $0xd0] sm:$0xff]  }
  0x2c   :  { %843 = vmatpush3.bf16.msra.mxu1 %v935_v7  ;;  %v951_v23 = vld [vmem:[#allocation4 + $0x90] sm:$0xff]   ;;  %v952_v24 = vld [vmem:[#allocation4 + $0x48] sm:$0xff]   ;;  %v956_v28 = vld [vmem:[#allocation4 + $0x40] sm:$0xff]  }
  0x2d   :  { %844 = vmatprep.subr.bf16.mxu1 %v938_v10  ;;  %v953_v25 = vld [vmem:[#allocation4 + $0x8] sm:$0xff]   ;;  %v957_v29 = vld [vmem:[#allocation4] sm:$0xff]   ;;  %v61_v31 = vld [vmem:[#allocation2 + $0x8] sm:$0xff] }
  0x2e   :  { %823 = vmatpush3.bf16.msra.mxu0 %v937_v9  ;;  %v954_v26 = vld [vmem:[#allocation4 + $0xc8] sm:$0xff]   ;;  %v958_v30 = vld [vmem:[#allocation4 + $0xc0] sm:$0xff]   ;;  %v68_v32 = vpack.c.bf16 %v61_v31, %v61_v31  ;;  %v960_v36 = vld [vmem:[#allocation4 + $0x178] sm:$0xff]  }
  0x2f   :  { %824 = vmatprep.subr.bf16.mxu0 %v940_v12  ;;  %v955_v27 = vld [vmem:[#allocation4 + $0x88] sm:$0xff]   ;;  %v959_v33 = vld [vmem:[#allocation4 + $0x80] sm:$0xff]   ;;  %v961_v39 = vld [vmem:[#allocation4 + $0x138] sm:$0xff]  }
  0x30   :  { %845 = vmatpush3.bf16.msra.mxu1 %v939_v11  ;;  %v60_v34 = vld [vmem:[#allocation2] sm:$0xff]  ;;  %v63_v37 = vld [vmem:[#allocation2 + $0x18] sm:$0xff]  ;;  %509 = vmatprep.mubr.bf16.mxu0 %v68_v32  ;;  %v62_v40 = vld [vmem:[#allocation2 + $0x10] sm:$0xff] }
  0x31   :  { %846 = vmatprep.subr.bf16.mxu1 %v942_v14  ;;  %v67_v35 = vpack.c.bf16 %v60_v34, %v60_v34  ;;  %v70_v38 = vpack.c.bf16 %v63_v37, %v63_v37  ;;  %v69_v41 = vpack.c.bf16 %v62_v40, %v62_v40  ;;  %v962_v42 = vld [vmem:[#allocation4 + $0x170] sm:$0xff]   ;;  %v964_v45 = vld [vmem:[#allocation4 + $0x168] sm:$0xff]   ;;  %v966_v47 = vld [vmem:[#allocation4 + $0x160] sm:$0xff]  }
  0x32   :  { %825 = vmatpush3.bf16.msra.mxu0 %v941_v13  ;;  %v963_v43 = vld [vmem:[#allocation4 + $0x130] sm:$0xff]   ;;  %v965_v46 = vld [vmem:[#allocation4 + $0x128] sm:$0xff]   ;;  %v967_v48 = vld [vmem:[#allocation4 + $0x120] sm:$0xff]  }
  0x33   :  { %826 = vmatprep.subr.bf16.mxu0 %v944_v16  ;;  %549 = vmatprep.mubr.bf16.mxu1 %v70_v38  ;;  %v968_v49 = vld [vmem:[#allocation4 + $0x158] sm:$0xff]   ;;  %v970_v51 = vld [vmem:[#allocation4 + $0x150] sm:$0xff]   ;;  %v976_v53 = vld [vmem:[#allocation4 + $0x180] sm:$0xff]  }
  0x34   :  { %847 = vmatpush3.bf16.msra.mxu1 %v943_v15  ;;  %v969_v50 = vld [vmem:[#allocation4 + $0x118] sm:$0xff]   ;;  %v971_v52 = vld [vmem:[#allocation4 + $0x110] sm:$0xff]   ;;  %v972_v55 = vld [vmem:[#allocation4 + $0x148] sm:$0xff]  }
  0x35   :  { %848 = vmatprep.subr.bf16.mxu1 %v946_v18  ;;  %v65_v54 = vld [vmem:[#allocation2 + $0x28] sm:$0xff]  ;;  %v66_v57 = vld [vmem:[#allocation2 + $0x30] sm:$0xff]  ;;  %v973_v59 = vld [vmem:[#allocation4 + $0x108] sm:$0xff]  }
  0x36   :  { %827 = vmatpush3.bf16.msra.mxu0 %v945_v17  ;;  %v72_v56 = vpack.c.bf16 %v65_v54, %v65_v54  ;;  %v73_v58 = vpack.c.bf16 %v66_v57, %v66_v57  ;;  %v974_v60 = vld [vmem:[#allocation4 + $0x140] sm:$0xff]   ;;  %v64_v62 = vld [vmem:[#allocation2 + $0x20] sm:$0xff]  ;;  %v978_v1 = vld [vmem:[#allocation6 + $0x30] sm:$0xff]  }
  0x37   :  { %828 = vmatprep.subr.bf16.mxu0 %v948_v20  ;;  %v975_v61 = vld [vmem:[#allocation4 + $0x100] sm:$0xff]   ;;  %v71_v63 = vpack.c.bf16 %v64_v62, %v64_v62  ;;  %v979_v2 = vld [vmem:[#allocation6 + $0x28] sm:$0xff]   ;;  %v980_v3 = vld [vmem:[#allocation6 + $0x20] sm:$0xff]  }
  0x38   :  { %849 = vmatpush3.bf16.msra.mxu1 %v947_v19  ;;  %v977_v0 = vld [vmem:[#allocation6 + $0x38] sm:$0xff]   ;;  %v982_v5 = vld [vmem:[#allocation6 + $0x10] sm:$0xff]   ;;  %v983_v6 = vld [vmem:[#allocation6 + $0x8] sm:$0xff]  }
  0x39   :  { %850 = vmatprep.subr.bf16.mxu1 %v950_v22  ;;  %v981_v4 = vld [vmem:[#allocation6 + $0x18] sm:$0xff]   ;;  %v984_v7 = vld [vmem:[#allocation6] sm:$0xff]  }
  0x3a   :  { %829 = vmatpush3.bf16.msra.mxu0 %v949_v21  ;;  %v758_v21 = vld [vmem:[%s1119_s2] ss:$0 sm:$0xff] }
  0x3b   :  { %830 = vmatprep.subr.bf16.mxu0 %v952_v24  ;;  %v809_v34 = vld [vmem:[%s1121_s4] ss:$0 sm:$0xff] }
  0x3c   :  { %851 = vmatpush3.bf16.msra.mxu1 %v951_v23 }
  0x3d   :  { %852 = vmatprep.subr.bf16.mxu1 %v954_v26 }
  0x3e   :  { %831 = vmatpush3.bf16.msra.mxu0 %v953_v25 }
  0x3f   :  { %832 = vmatprep.subr.bf16.mxu0 %v956_v28 }
  0x40   :  { %853 = vmatpush3.bf16.msra.mxu1 %v955_v27 }
  0x41   :  { %854 = vmatprep.subr.bf16.mxu1 %v958_v30 }
  0x42   :  { %833 = vmatpush3.bf16.msra.mxu0 %v957_v29 }
  0x43   :  { %862 = vmatprep.subr.bf16.mxu0 %v960_v36 }
  0x44   :  { %855 = vmatpush3.bf16.msra.mxu1 %v959_v33 }
  0x45   :  { %510 = vmatmul.mubr.bf16.vlgmr.msra.gmra.mxu0 %v67_v35  ;;  %895 = vmatprep.subr.bf16.mxu1 %v1054_v44 }
  0x46   :  { %863 = vmatpush3.bf16.msra.mxu0 %v961_v39  ;;  %589 = vmatprep.mubr.bf16.mxu0 %v72_v56 }
  0x47   :  { %550 = vmatmul.mubr.bf16.vlgmr.msra.gmra.mxu1 %v69_v41  ;;  %864 = vmatprep.subr.bf16.mxu0 %v962_v42 }
  0x48   :  { %897 = vmatprep.mubr.msk.bf16.mxu1 %vm1055_vm0, %v1054_v44  ;;  %896 = vmatpush3.bf16.msra.mxu1 %v976_v53 }
  0x49   :  { %901 = vmatprep.subr.bf16.mxu1 %v1054_v44 }
  0x4a   :  { %865 = vmatpush3.bf16.msra.mxu0 %v963_v43 }
  0x4b   :  { %866 = vmatprep.subr.bf16.mxu0 %v964_v45 }
  0x4e   :  { %867 = vmatpush3.bf16.msra.mxu0 %v965_v46 }
  0x4f   :  { %868 = vmatprep.subr.bf16.mxu0 %v966_v47  ;;  %898 = vmatmul.mubr.msk.bf16.vlgmr.msra.gmra.mxu1 %vm473_vm1, %v73_v58 }
  0x50   :  { %917 = vmatprep.mubr.msk.bf16.mxu1 %vm1055_vm0, %v1054_v44  ;;  %902 = vmatpush3.bf16.msra.mxu1 %v977_v0 }
  0x51   :  { %903 = vmatprep.subr.bf16.mxu1 %v1054_v44 }
  0x52   :  { %869 = vmatpush3.bf16.msra.mxu0 %v967_v48 }
  0x53   :  { %870 = vmatprep.subr.bf16.mxu0 %v968_v49 }
  0x54   :  { %904 = vmatpush3.bf16.msra.mxu1 %v978_v1 }
  0x55   :  { %905 = vmatprep.subr.bf16.mxu1 %v1054_v44 }
  0x56   :  { %871 = vmatpush3.bf16.msra.mxu0 %v969_v50 }
  0x57   :  { %872 = vmatprep.subr.bf16.mxu0 %v970_v51 }
  0x58   :  { %906 = vmatpush3.bf16.msra.mxu1 %v979_v2 }
  0x59   :  { %907 = vmatprep.subr.bf16.mxu1 %v1054_v44 }
  0x5a   :  { %873 = vmatpush3.bf16.msra.mxu0 %v971_v52 }
  0x5b   :  { %874 = vmatprep.subr.bf16.mxu0 %v972_v55 }
  0x5c   :  { %908 = vmatpush3.bf16.msra.mxu1 %v980_v3 }
  0x5d   :  { %909 = vmatprep.subr.bf16.mxu1 %v1054_v44 }
  0x5e   :  { %875 = vmatpush3.bf16.msra.mxu0 %v973_v59 }
  0x5f   :  { %876 = vmatprep.subr.bf16.mxu0 %v974_v60 }
  0x60   :  { %910 = vmatpush3.bf16.msra.mxu1 %v981_v4 }
  0x61   :  { %911 = vmatprep.subr.bf16.mxu1 %v1054_v44 }
  0x62   :  { %877 = vmatpush3.bf16.msra.mxu0 %v975_v61 }
  0x64   :  { %912 = vmatpush3.bf16.msra.mxu1 %v982_v5 }
  0x65   :  { %590 = vmatmul.mubr.bf16.vlgmr.msra.gmra.mxu0 %v71_v63  ;;  %913 = vmatprep.subr.bf16.mxu1 %v1054_v44 }
  0x68   :  { %914 = vmatpush3.bf16.msra.mxu1 %v983_v6 }
  0x69   :  { %915 = vmatprep.subr.bf16.mxu1 %v1054_v44 }
  0x6c   :  { %916 = vmatpush3.bf16.msra.mxu1 %v984_v7 }
 0x105   :  { %v834_v8 = vpop.f32.mrf.mxu0 }
 0x107   :  { %v835_v9 = vpop.f32.mrf.mxu0  ;;  %v856_v10 = vpop.f32.mrf.mxu1 }
 0x108   :  { %v836_v20 = vadd.f32 %v835_v9, %v834_v8 }
 0x109   :  { %v837_v11 = vpop.f32.mrf.mxu0  ;;  %v857_v12 = vpop.f32.mrf.mxu1 }
 0x10a   :  { %v512_v22 = vadd.f32 %v836_v20, %v758_v21  ;;  %v858_v23 = vadd.f32 %v857_v12, %v856_v10 }
 0x10b   :  { %v838_v13 = vpop.f32.mrf.mxu0  ;;  %v859_v14 = vpop.f32.mrf.mxu1 }
 0x10c   :  { %v552_v26 = vadd.f32 %v858_v23, %v512_v22 }
 0x10d   :  { %v860_v15 = vpop.f32.mrf.mxu1 }
 0x10f   :  { %v631_v16 = vpop.f32.mrf.mxu1 }
 0x111   :  { %v899_v17 = vpop.f32.mrf.mxu1 }
 0x113   :  { %v634_v18 = vpop.f32.mrf.mxu1 }
 0x115   :  { %v900_v19 = vpop.f32.mrf.mxu1 }
 0x125   :  { %v878_v24 = vpop.f32.mrf.mxu0 }
 0x127   :  { %v879_v25 = vpop.f32.mrf.mxu0 }
 0x128   :  { %v880_v27 = vadd.f32 %v879_v25, %v878_v24 }
 0x129   :  { %v881_v28 = vpop.f32.mrf.mxu0 }
 0x12a   :  { %v592_v29 = vadd.f32 %v880_v27, %v552_v26 }
 0x12b   :  { %v882_v30 = vpop.f32.mrf.mxu0 }
 0x12c   :  { %v632_v31 = vadd.f32 %v631_v16, %v592_v29 }
 0x12e   :  { %v637_v32 = vmax.f32 %v632_v31, 0.0 }
 0x130   :  { %v638_v33 = vpack.c.bf16 %v637_v32, %v637_v32 }
 0x132   :  { %918 = vmatmul.mubr.bf16.vlgmr.msra.gmra.mxu1 %v638_v33 }
 0x1f2   :  { %v744_v35 = vpop.f32.mrf.mxu1 }
 0x1f3   :  { %v745_v36 = vadd.f32 %v809_v34, %v744_v35 }
 0x1f4   :  { %v919_v37 = vpop.f32.mrf.mxu1 }
 0x1f5   :  { %v750_v38 = vpack.c.bf16 %v745_v36, %v745_v36 }
 0x1f6   :  { %v747_v39 = vpop.f32.mrf.mxu1 }
 0x1f7   :  { %751 = vst [vmem:[%s1122_s5] sm:$0xf] %v750_v38 }
 0x1f8   :  { %v920_v40 = vpop.f32.mrf.mxu1 }
 0x1f9   :  { %756 = vsyncpa [#allocation3], 1 }
 0x1fa   :  { %757 = vsyncpa [#allocation5], 1 }

</bundles_post_ra>
